<compile_context>
chip_gen: v6e
topology: v6e:2x2x1
jax: 0.10.0
libtpu: 0.0.40
codegen_flags: <defaults>
</compile_context>

<pallas_src>
import math
from functools import partial

import jax
import jax.numpy as jnp
from jax import lax
from jax.experimental import pallas as pl
from jax.experimental.pallas import tpu as pltpu


def _ceil_to(x, m):
    return ((x + m - 1) // m) * m


def _conv_tile(xm, xh, w_ref, *, K, dilation, TL, use_mxu):
    """Dilated Conv1d for one lane tile. Returns (C_out, TL) float32."""
    xt = jnp.concatenate([xm, xh], axis=-1)                 # (C_in, TL + HW)
    if use_mxu:
        # im2col built as a value (no scratch-ref vst->vld round trip), then a
        # single folded MXU dot with bf16 operands / f32 accumulation.
        taps = [xt[:, k * dilation:k * dilation + TL] for k in range(K)]
        stk = jnp.concatenate(taps, axis=0).astype(w_ref.dtype)   # (K*C_in, TL)
        return jnp.dot(w_ref[...], stk, preferred_element_type=jnp.float32)
    # Small-channel path: K*C_in unrolled VPU FMAs, no MXU, full f32.
    C_in = xm.shape[0]
    C_out = w_ref.shape[0]
    xt = xt.astype(jnp.float32)
    acc = jnp.zeros((C_out, TL), jnp.float32)
    for k in range(K):
        off = k * dilation
        for c in range(C_in):
            idx = k * C_in + c
            acc = acc + w_ref[:, idx:idx + 1] * xt[c:c + 1, off:off + TL]
    return acc


def conv_stats_kernel(xm_ref, xh_ref, w_ref, stats_ref,
                      *, K, dilation, TL, L_out, num_tiles, use_mxu, need_mask):
    """Pass 1: conv tile + lane-dense per-channel partial sum / sum-of-squares."""
    j = pl.program_id(1)
    C_out = w_ref.shape[0]

    @pl.when(j == 0)
    def _():
        stats_ref[...] = jnp.zeros_like(stats_ref)

    y = _conv_tile(xm_ref[0], xh_ref[0], w_ref,
                   K=K, dilation=dilation, TL=TL, use_mxu=use_mxu)

    def accum(yv):
        # 128-lane-wide partial sums; the final 128 -> 1 reduce happens in the
        # JAX glue. Avoids per-tile full cross-lane reductions and single-lane
        # masked stores.
        ps = jnp.zeros((C_out, 128), jnp.float32)
        psq = jnp.zeros((C_out, 128), jnp.float32)
        for i in range(TL // 128):
            c = yv[:, i * 128:(i + 1) * 128]
            ps = ps + c
            psq = psq + c * c
        stats_ref[0, 0] = stats_ref[0, 0] + ps
        stats_ref[0, 1] = stats_ref[0, 1] + psq

    if not need_mask:
        accum(y)
    else:
        # Only the last L-tile can contain lanes >= L_out.
        @pl.when(j < num_tiles - 1)
        def _():
            accum(y)

        @pl.when(j == num_tiles - 1)
        def _():
            lane = lax.broadcasted_iota(jnp.int32, y.shape, 1) + j * TL
            accum(jnp.where(lane < L_out, y, 0.0))


def conv_bn_relu_kernel(xm_ref, xh_ref, w_ref, scale_ref, shift_ref, o_ref,
                        *, K, dilation, TL, use_mxu):
    """Pass 2: recompute conv, fold BN into per-channel affine, ReLU, store."""
    y = _conv_tile(xm_ref[0], xh_ref[0], w_ref,
                   K=K, dilation=dilation, TL=TL, use_mxu=use_mxu)
    o_ref[0] = jnp.maximum(y * scale_ref[...] + shift_ref[...], 0.0
                           ).astype(o_ref.dtype)


def tcn_block(x, weight, bias, gamma, beta, *, kernel_size, dilation=1,
              eps=1e-5, lane_tile=1024, vmem_budget_bytes=10 * 2 ** 20):
    """x: (N, C_in, L); weight: (C_out, C_in, K); bias/gamma/beta: (C_out,)."""
    del bias  # cancels exactly under training-mode BatchNorm (see header note)
    N, C_in, L = x.shape
    C_out = weight.shape[0]
    K = kernel_size
    pad = (K - 1) * dilation // 2
    halo = dilation * (K - 1)
    L_out = L + 2 * pad - halo

    # Small-channel configs bypass the MXU (VPU FMA path, f32); otherwise use
    # a single folded bf16 MXU matmul per tile.
    use_mxu = not (K * C_in <= 32 and C_out <= 64)
    w_dtype = jnp.bfloat16 if use_mxu else jnp.float32
    w2 = jnp.transpose(weight, (0, 2, 1)).reshape(C_out, K * C_in).astype(w_dtype)

    # ------------------------------ tiling -----------------------------------
    HW = max(128, _ceil_to(halo, 128))            # right-halo block (aligned)
    TL = min(lane_tile, _ceil_to(L_out, 128))     # output lanes per tile
    TL = _ceil_to(max(TL, HW), HW)                # multiple of 128 and of HW
    # Cap the per-step footprint (double-buffered x tiles + im2col stack +
    # double-buffered output tile). Matters on v7x's 64 MiB VMEM.
    x_bytes = jnp.dtype(x.dtype).itemsize
    w_bytes = jnp.dtype(w_dtype).itemsize
    per_lane = (2 * C_in * x_bytes
                + (K * C_in * w_bytes if use_mxu else 0)
                + 3 * C_out * 4)
    while TL > HW and TL * per_lane > vmem_budget_bytes:
        TL = max(HW, _ceil_to(TL // 2, HW))
    num_tiles = pl.cdiv(L_out, TL)
    Lp = num_tiles * TL
    halo_blk = TL // HW

    # Left pad = conv padding; right pad so every tile's main + halo window is
    # in range (kept in the input's original dtype).
    # TODO(synk): the host-side pad costs one extra read+write of the input; it
    # could be removed with in-kernel edge masking / a left-halo block.
    right = Lp + HW - pad - L
    assert right >= 0
    xpad = jnp.pad(x, ((0, 0), (0, 0), (pad, right)))

    vmem_limit = 48 * 2 ** 20   # above scoped defaults, below v7x physical

    # ------------- pass 1: stats only (no conv activation in HBM) ------------
    kern1 = partial(conv_stats_kernel, K=K, dilation=dilation, TL=TL,
                    L_out=L_out, num_tiles=num_tiles, use_mxu=use_mxu,
                    need_mask=(Lp > L_out))
    stats = pl.pallas_call(
        kern1,
        out_shape=jax.ShapeDtypeStruct((N, 2, C_out, 128), jnp.float32),
        grid=(N, num_tiles),
        in_specs=[
            pl.BlockSpec((1, C_in, TL), lambda n, j: (n, 0, j)),
            pl.BlockSpec((1, C_in, HW), lambda n, j: (n, 0, (j + 1) * halo_blk)),
            pl.BlockSpec((C_out, K * C_in), lambda n, j: (0, 0)),
        ],
        out_specs=pl.BlockSpec((1, 2, C_out, 128), lambda n, j: (n, 0, 0, 0)),
        compiler_params=pltpu.CompilerParams(
            dimension_semantics=("parallel", "arbitrary"),
            vmem_limit_bytes=vmem_limit),
    )(xpad, xpad, w2)

    # ------------- tiny glue: finish BN reduction, fold gamma/beta -----------
    cnt = float(N * L_out)
    gamma = gamma.astype(jnp.float32)
    beta = beta.astype(jnp.float32)
    ssum = jnp.sum(stats[:, 0], axis=(0, 2))
    ssq = jnp.sum(stats[:, 1], axis=(0, 2))
    mean = ssum / cnt
    # NOTE: E[y^2] - E[y]^2 is cancellative when |mean| >> std; fine for
    # conv activations here, a shifted/Welford accumulation would be sturdier.
    var = jnp.maximum(ssq / cnt - mean * mean, 0.0)          # biased variance
    inv = lax.rsqrt(var + eps)
    scale = (gamma * inv).reshape(C_out, 1)
    shift = (beta - mean * gamma * inv).reshape(C_out, 1)

    # --------- pass 2: recompute conv, BN affine + ReLU, lane-dense store ----
    kern2 = partial(conv_bn_relu_kernel, K=K, dilation=dilation, TL=TL,
                    use_mxu=use_mxu)
    out = pl.pallas_call(
        kern2,
        out_shape=jax.ShapeDtypeStruct((N, C_out, L_out), x.dtype),
        grid=(N, num_tiles),
        in_specs=[
            pl.BlockSpec((1, C_in, TL), lambda n, j: (n, 0, j)),
            pl.BlockSpec((1, C_in, HW), lambda n, j: (n, 0, (j + 1) * halo_blk)),
            pl.BlockSpec((C_out, K * C_in), lambda n, j: (0, 0)),
            pl.BlockSpec((C_out, 1), lambda n, j: (0, 0)),
            pl.BlockSpec((C_out, 1), lambda n, j: (0, 0)),
        ],
        out_specs=pl.BlockSpec((1, C_out, TL), lambda n, j: (n, 0, j)),
        compiler_params=pltpu.CompilerParams(
            dimension_semantics=("parallel", "parallel"),
            vmem_limit_bytes=vmem_limit),
    )(xpad, xpad, w2, scale, shift)

    # TODO(synk): Dropout left as identity (training-mode RNG not reproduced).
    return out


def tcn_reference(x, weight, bias, gamma, beta, *, kernel_size, dilation=1, eps=1e-5):
    """Pure-JAX reference matching PyTorch Conv1d + BatchNorm1d(train) + ReLU."""
    pad = (kernel_size - 1) * dilation // 2
    y = lax.conv_general_dilated(
        x, weight,
        window_strides=(1,),
        padding=[(pad, pad)],
        rhs_dilation=(dilation,),
        dimension_numbers=("NCH", "OIH", "NCH"),
    ) + bias.reshape(1, -1, 1)
    mean = jnp.mean(y, axis=(0, 2), keepdims=True)
    var = jnp.mean((y - mean) ** 2, axis=(0, 2), keepdims=True)
    y = (y - mean) * lax.rsqrt(var + eps) * gamma.reshape(1, -1, 1) + beta.reshape(1, -1, 1)
    return jnp.maximum(y, 0.0)


if __name__ == "__main__":
    def run_case(N, C_in, C_out, L, K, dil, seed, atol, rtol, lane_tile=1024):
        key = jax.random.PRNGKey(seed)
        kx, kw, kb, kg, kbt = jax.random.split(key, 5)
        x = jax.random.normal(kx, (N, C_in, L), dtype=jnp.float32)
        bound = 1.0 / math.sqrt(C_in * K)
        weight = jax.random.uniform(kw, (C_out, C_in, K), minval=-bound,
                                    maxval=bound, dtype=jnp.float32)
        bias = jax.random.uniform(kb, (C_out,), minval=-bound, maxval=bound,
                                  dtype=jnp.float32)
        gamma = jax.random.uniform(kg, (C_out,), minval=0.5, maxval=1.5,
                                   dtype=jnp.float32)
        beta = 0.1 * jax.random.normal(kbt, (C_out,), dtype=jnp.float32)

        out = jax.block_until_ready(
            tcn_block(x, weight, bias, gamma, beta, kernel_size=K,
                      dilation=dil, lane_tile=lane_tile))
        ref = jax.block_until_ready(
            tcn_reference(x, weight, bias, gamma, beta, kernel_size=K,
                          dilation=dil))
        assert out.shape == ref.shape, (out.shape, ref.shape)
        err = float(jnp.max(jnp.abs(out - ref)))
        assert jnp.allclose(out, ref, atol=atol, rtol=rtol), err

    # 1) Small-channel config (VPU conv path, f32), matches
    #    TCNBlock(in_channels=4, out_channels=8, kernel_size=3, dilation=2).
    run_case(N=2, C_in=4, C_out=8, L=16, K=3, dil=2, seed=0,
             atol=1e-4, rtol=1e-4)
    # 2) Small-channel, multi-tile (exercises halo across tiles + last-tile mask).
    run_case(N=2, C_in=4, C_out=8, L=300, K=3, dil=2, seed=1,
             atol=1e-4, rtol=1e-4, lane_tile=128)
    # 3) Larger channels, multi-tile: exercises the bf16 MXU path
    #    (looser tolerance per bf16 operands).
    run_case(N=2, C_in=16, C_out=32, L=700, K=3, dil=1, seed=2,
             atol=2e-2, rtol=2e-2, lane_tile=256)

    print("KERNEL_OK")
</pallas_src>

<mosaic_0001>
module attributes {stable_mosaic.version = 11 : i64} {
  func.func @conv_stats_kernel(%arg0: i32, %arg1: i32, %arg2: memref<1x4x128xf32, #tpu.memory_space<vmem>>, %arg3: memref<1x4x128xf32, #tpu.memory_space<vmem>>, %arg4: memref<8x12xf32, #tpu.memory_space<vmem>>, %arg5: memref<1x2x8x128xf32, #tpu.memory_space<vmem>>) attributes {dimension_semantics = [#tpu.dimension_semantics<parallel>, #tpu.dimension_semantics<arbitrary>], iteration_bounds = array<i64: 2, 1>, scalar_prefetch = 0 : i64, scratch_operands = 0 : i64, tpu.core_type = #tpu.core_type<tc>, window_params = [{transform_indices = @transform_0, window_bounds = array<i64: 1, 4, 128>}, {transform_indices = @transform_1, window_bounds = array<i64: 1, 4, 128>}, {pipeline_mode = #tpu.pipeline_mode<synchronous>, transform_indices = @transform_2, window_bounds = array<i64: 8, 12>}, {transform_indices = @transform_3, window_bounds = array<i64: 1, 2, 8, 128>}]} {
    %c0_i32 = arith.constant 0 : i32
    %0 = arith.cmpi eq, %arg1, %c0_i32 : i32
    %1 = arith.extui %0 : i1 to i32
    %c0_i32_0 = arith.constant 0 : i32
    %2 = arith.cmpi ne, %1, %c0_i32_0 : i32
    scf.if %2 {
      %cst_23 = arith.constant 0.000000e+00 : f32
      %87 = vector.broadcast %cst_23 : f32 to vector<1x2x8x128xf32>
      %c0_24 = arith.constant 0 : index
      %c0_25 = arith.constant 0 : index
      %c0_26 = arith.constant 0 : index
      %c0_27 = arith.constant 0 : index
      %88 = vector.load %arg5[%c0_24, %c0_25, %c0_26, %c0_27] : memref<1x2x8x128xf32, #tpu.memory_space<vmem>>, vector<1x2x8x128xf32>
      tpu.vector_store %arg5[%c0_24, %c0_25, %c0_26, %c0_27], %87 {strides = array<i32>} : memref<1x2x8x128xf32, #tpu.memory_space<vmem>>, vector<1x2x8x128xf32>,
    } else {
    }
    %c0 = arith.constant 0 : index
    %c0_1 = arith.constant 0 : index
    %c0_2 = arith.constant 0 : index
    %3 = vector.load %arg2[%c0, %c0_1, %c0_2] : memref<1x4x128xf32, #tpu.memory_space<vmem>>, vector<1x4x128xf32>
    %4 = vector.shape_cast %3 : vector<1x4x128xf32> to vector<4x128xf32>
    %c0_3 = arith.constant 0 : index
    %c0_4 = arith.constant 0 : index
    %c0_5 = arith.constant 0 : index
    %5 = vector.load %arg3[%c0_3, %c0_4, %c0_5] : memref<1x4x128xf32, #tpu.memory_space<vmem>>, vector<1x4x128xf32>
    %6 = vector.shape_cast %5 : vector<1x4x128xf32> to vector<4x128xf32>
    %7 = tpu.concatenate %4, %6 in 1 : vector<4x128xf32>, vector<4x128xf32> -> vector<4x256xf32>
    %cst = arith.constant 0.000000e+00 : f32
    %8 = vector.broadcast %cst : f32 to vector<8x128xf32>
    %c0_6 = arith.constant 0 : index
    %c0_7 = arith.constant 0 : index
    %9 = vector.load %arg4[%c0_6, %c0_7] : memref<8x12xf32, #tpu.memory_space<vmem>>, vector<8x1xf32>
    %10 = vector.extract_strided_slice %7 {offsets = [0, 0], sizes = [1, 128], strides = [1, 1]} : vector<4x256xf32> to vector<1x128xf32>
    %11 = vector.broadcast %9 : vector<8x1xf32> to vector<8x128xf32>
    %12 = vector.broadcast %10 : vector<1x128xf32> to vector<8x128xf32>
    %13 = arith.mulf %11, %12 : vector<8x128xf32>
    %14 = arith.addf %8, %13 : vector<8x128xf32>
    %c0_8 = arith.constant 0 : index
    %c1 = arith.constant 1 : index
    %15 = vector.load %arg4[%c0_8, %c1] : memref<8x12xf32, #tpu.memory_space<vmem>>, vector<8x1xf32>
    %16 = vector.extract_strided_slice %7 {offsets = [1, 0], sizes = [1, 128], strides = [1, 1]} : vector<4x256xf32> to vector<1x128xf32>
    %17 = vector.broadcast %15 : vector<8x1xf32> to vector<8x128xf32>
    %18 = vector.broadcast %16 : vector<1x128xf32> to vector<8x128xf32>
    %19 = arith.mulf %17, %18 : vector<8x128xf32>
    %20 = arith.addf %14, %19 : vector<8x128xf32>
    %c0_9 = arith.constant 0 : index
    %c2 = arith.constant 2 : index
    %21 = vector.load %arg4[%c0_9, %c2] : memref<8x12xf32, #tpu.memory_space<vmem>>, vector<8x1xf32>
    %22 = vector.extract_strided_slice %7 {offsets = [2, 0], sizes = [1, 128], strides = [1, 1]} : vector<4x256xf32> to vector<1x128xf32>
    %23 = vector.broadcast %21 : vector<8x1xf32> to vector<8x128xf32>
    %24 = vector.broadcast %22 : vector<1x128xf32> to vector<8x128xf32>
    %25 = arith.mulf %23, %24 : vector<8x128xf32>
    %26 = arith.addf %20, %25 : vector<8x128xf32>
    %c0_10 = arith.constant 0 : index
    %c3 = arith.constant 3 : index
    %27 = vector.load %arg4[%c0_10, %c3] : memref<8x12xf32, #tpu.memory_space<vmem>>, vector<8x1xf32>
    %28 = vector.extract_strided_slice %7 {offsets = [3, 0], sizes = [1, 128], strides = [1, 1]} : vector<4x256xf32> to vector<1x128xf32>
    %29 = vector.broadcast %27 : vector<8x1xf32> to vector<8x128xf32>
    %30 = vector.broadcast %28 : vector<1x128xf32> to vector<8x128xf32>
    %31 = arith.mulf %29, %30 : vector<8x128xf32>
    %32 = arith.addf %26, %31 : vector<8x128xf32>
    %c0_11 = arith.constant 0 : index
    %c4 = arith.constant 4 : index
    %33 = vector.load %arg4[%c0_11, %c4] : memref<8x12xf32, #tpu.memory_space<vmem>>, vector<8x1xf32>
    %34 = vector.extract_strided_slice %7 {offsets = [0, 2], sizes = [1, 128], strides = [1, 1]} : vector<4x256xf32> to vector<1x128xf32>
    %35 = vector.broadcast %33 : vector<8x1xf32> to vector<8x128xf32>
    %36 = vector.broadcast %34 : vector<1x128xf32> to vector<8x128xf32>
    %37 = arith.mulf %35, %36 : vector<8x128xf32>
    %38 = arith.addf %32, %37 : vector<8x128xf32>
    %c0_12 = arith.constant 0 : index
    %c5 = arith.constant 5 : index
    %39 = vector.load %arg4[%c0_12, %c5] : memref<8x12xf32, #tpu.memory_space<vmem>>, vector<8x1xf32>
    %40 = vector.extract_strided_slice %7 {offsets = [1, 2], sizes = [1, 128], strides = [1, 1]} : vector<4x256xf32> to vector<1x128xf32>
    %41 = vector.broadcast %39 : vector<8x1xf32> to vector<8x128xf32>
    %42 = vector.broadcast %40 : vector<1x128xf32> to vector<8x128xf32>
    %43 = arith.mulf %41, %42 : vector<8x128xf32>
    %44 = arith.addf %38, %43 : vector<8x128xf32>
    %c0_13 = arith.constant 0 : index
    %c6 = arith.constant 6 : index
    %45 = vector.load %arg4[%c0_13, %c6] : memref<8x12xf32, #tpu.memory_space<vmem>>, vector<8x1xf32>
    %46 = vector.extract_strided_slice %7 {offsets = [2, 2], sizes = [1, 128], strides = [1, 1]} : vector<4x256xf32> to vector<1x128xf32>
    %47 = vector.broadcast %45 : vector<8x1xf32> to vector<8x128xf32>
    %48 = vector.broadcast %46 : vector<1x128xf32> to vector<8x128xf32>
    %49 = arith.mulf %47, %48 : vector<8x128xf32>
    %50 = arith.addf %44, %49 : vector<8x128xf32>
    %c0_14 = arith.constant 0 : index
    %c7 = arith.constant 7 : index
    %51 = vector.load %arg4[%c0_14, %c7] : memref<8x12xf32, #tpu.memory_space<vmem>>, vector<8x1xf32>
    %52 = vector.extract_strided_slice %7 {offsets = [3, 2], sizes = [1, 128], strides = [1, 1]} : vector<4x256xf32> to vector<1x128xf32>
    %53 = vector.broadcast %51 : vector<8x1xf32> to vector<8x128xf32>
    %54 = vector.broadcast %52 : vector<1x128xf32> to vector<8x128xf32>
    %55 = arith.mulf %53, %54 : vector<8x128xf32>
    %56 = arith.addf %50, %55 : vector<8x128xf32>
    %c0_15 = arith.constant 0 : index
    %c8 = arith.constant 8 : index
    %57 = vector.load %arg4[%c0_15, %c8] : memref<8x12xf32, #tpu.memory_space<vmem>>, vector<8x1xf32>
    %58 = vector.extract_strided_slice %7 {offsets = [0, 4], sizes = [1, 128], strides = [1, 1]} : vector<4x256xf32> to vector<1x128xf32>
    %59 = vector.broadcast %57 : vector<8x1xf32> to vector<8x128xf32>
    %60 = vector.broadcast %58 : vector<1x128xf32> to vector<8x128xf32>
    %61 = arith.mulf %59, %60 : vector<8x128xf32>
    %62 = arith.addf %56, %61 : vector<8x128xf32>
    %c0_16 = arith.constant 0 : index
    %c9 = arith.constant 9 : index
    %63 = vector.load %arg4[%c0_16, %c9] : memref<8x12xf32, #tpu.memory_space<vmem>>, vector<8x1xf32>
    %64 = vector.extract_strided_slice %7 {offsets = [1, 4], sizes = [1, 128], strides = [1, 1]} : vector<4x256xf32> to vector<1x128xf32>
    %65 = vector.broadcast %63 : vector<8x1xf32> to vector<8x128xf32>
    %66 = vector.broadcast %64 : vector<1x128xf32> to vector<8x128xf32>
    %67 = arith.mulf %65, %66 : vector<8x128xf32>
    %68 = arith.addf %62, %67 : vector<8x128xf32>
    %c0_17 = arith.constant 0 : index
    %c10 = arith.constant 10 : index
    %69 = vector.load %arg4[%c0_17, %c10] : memref<8x12xf32, #tpu.memory_space<vmem>>, vector<8x1xf32>
    %70 = vector.extract_strided_slice %7 {offsets = [2, 4], sizes = [1, 128], strides = [1, 1]} : vector<4x256xf32> to vector<1x128xf32>
    %71 = vector.broadcast %69 : vector<8x1xf32> to vector<8x128xf32>
    %72 = vector.broadcast %70 : vector<1x128xf32> to vector<8x128xf32>
    %73 = arith.mulf %71, %72 : vector<8x128xf32>
    %74 = arith.addf %68, %73 : vector<8x128xf32>
    %c0_18 = arith.constant 0 : index
    %c11 = arith.constant 11 : index
    %75 = vector.load %arg4[%c0_18, %c11] : memref<8x12xf32, #tpu.memory_space<vmem>>, vector<8x1xf32>
    %76 = vector.extract_strided_slice %7 {offsets = [3, 4], sizes = [1, 128], strides = [1, 1]} : vector<4x256xf32> to vector<1x128xf32>
    %77 = vector.broadcast %75 : vector<8x1xf32> to vector<8x128xf32>
    %78 = vector.broadcast %76 : vector<1x128xf32> to vector<8x128xf32>
    %79 = arith.mulf %77, %78 : vector<8x128xf32>
    %80 = arith.addf %74, %79 : vector<8x128xf32>
    %c0_i32_19 = arith.constant 0 : i32
    %81 = arith.cmpi slt, %arg1, %c0_i32_19 : i32
    %82 = arith.extui %81 : i1 to i32
    %c0_i32_20 = arith.constant 0 : i32
    %83 = arith.cmpi ne, %82, %c0_i32_20 : i32
    scf.if %83 {
      %cst_23 = arith.constant 0.000000e+00 : f32
      %87 = vector.broadcast %cst_23 : f32 to vector<8x128xf32>
      %cst_24 = arith.constant 0.000000e+00 : f32
      %88 = vector.broadcast %cst_24 : f32 to vector<8x128xf32>
      %89 = arith.addf %87, %80 : vector<8x128xf32>
      %90 = arith.mulf %80, %80 : vector<8x128xf32>
      %91 = arith.addf %88, %90 : vector<8x128xf32>
      %c0_25 = arith.constant 0 : index
      %c0_26 = arith.constant 0 : index
      %c0_27 = arith.constant 0 : index
      %c0_28 = arith.constant 0 : index
      %92 = vector.load %arg5[%c0_25, %c0_26, %c0_27, %c0_28] : memref<1x2x8x128xf32, #tpu.memory_space<vmem>>, vector<1x1x8x128xf32>
      %93 = vector.shape_cast %92 : vector<1x1x8x128xf32> to vector<8x128xf32>
      %94 = arith.addf %93, %89 : vector<8x128xf32>
      %c0_29 = arith.constant 0 : index
      %c0_30 = arith.constant 0 : index
      %c0_31 = arith.constant 0 : index
      %c0_32 = arith.constant 0 : index
      %95 = vector.load %arg5[%c0_29, %c0_30, %c0_31, %c0_32] : memref<1x2x8x128xf32, #tpu.memory_space<vmem>>, vector<1x1x8x128xf32>
      %96 = vector.shape_cast %95 : vector<1x1x8x128xf32> to vector<8x128xf32>
      %97 = vector.shape_cast %94 : vector<8x128xf32> to vector<1x1x8x128xf32>
      tpu.vector_store %arg5[%c0_29, %c0_30, %c0_31, %c0_32], %97 {strides = array<i32>} : memref<1x2x8x128xf32, #tpu.memory_space<vmem>>, vector<1x1x8x128xf32>,
      %c0_33 = arith.constant 0 : index
      %c1_34 = arith.constant 1 : index
      %c0_35 = arith.constant 0 : index
      %c0_36 = arith.constant 0 : index
      %98 = vector.load %arg5[%c0_33, %c1_34, %c0_35, %c0_36] : memref<1x2x8x128xf32, #tpu.memory_space<vmem>>, vector<1x1x8x128xf32>
      %99 = vector.shape_cast %98 : vector<1x1x8x128xf32> to vector<8x128xf32>
      %100 = arith.addf %99, %91 : vector<8x128xf32>
      %c0_37 = arith.constant 0 : index
      %c1_38 = arith.constant 1 : index
      %c0_39 = arith.constant 0 : index
      %c0_40 = arith.constant 0 : index
      %101 = vector.load %arg5[%c0_37, %c1_38, %c0_39, %c0_40] : memref<1x2x8x128xf32, #tpu.memory_space<vmem>>, vector<1x1x8x128xf32>
      %102 = vector.shape_cast %101 : vector<1x1x8x128xf32> to vector<8x128xf32>
      %103 = vector.shape_cast %100 : vector<8x128xf32> to vector<1x1x8x128xf32>
      tpu.vector_store %arg5[%c0_37, %c1_38, %c0_39, %c0_40], %103 {strides = array<i32>} : memref<1x2x8x128xf32, #tpu.memory_space<vmem>>, vector<1x1x8x128xf32>,
    } else {
    }
    %c0_i32_21 = arith.constant 0 : i32
    %84 = arith.cmpi eq, %arg1, %c0_i32_21 : i32
    %85 = arith.extui %84 : i1 to i32
    %c0_i32_22 = arith.constant 0 : i32
    %86 = arith.cmpi ne, %85, %c0_i32_22 : i32
    scf.if %86 {
      %87 = tpu.iota {dimensions = array<i32: 1>} : vector<8x128xi32>
      %c128_i32 = arith.constant 128 : i32
      %88 = arith.muli %arg1, %c128_i32 : i32
      %89 = vector.broadcast %88 : i32 to vector<8x128xi32>
      %90 = arith.addi %87, %89 : vector<8x128xi32>
      %c16_i32 = arith.constant 16 : i32
      %91 = vector.broadcast %c16_i32 : i32 to vector<8x128xi32>
      %92 = arith.cmpi slt, %90, %91 : vector<8x128xi32>
      %cst_23 = arith.constant 0.000000e+00 : f32
      %93 = vector.broadcast %cst_23 : f32 to vector<8x128xf32>
      %94 = arith.select %92, %80, %93 : vector<8x128xi1>, vector<8x128xf32>
      %cst_24 = arith.constant 0.000000e+00 : f32
      %95 = vector.broadcast %cst_24 : f32 to vector<8x128xf32>
      %cst_25 = arith.constant 0.000000e+00 : f32
      %96 = vector.broadcast %cst_25 : f32 to vector<8x128xf32>
      %97 = arith.addf %95, %94 : vector<8x128xf32>
      %98 = arith.mulf %94, %94 : vector<8x128xf32>
      %99 = arith.addf %96, %98 : vector<8x128xf32>
      %c0_26 = arith.constant 0 : index
      %c0_27 = arith.constant 0 : index
      %c0_28 = arith.constant 0 : index
      %c0_29 = arith.constant 0 : index
      %100 = vector.load %arg5[%c0_26, %c0_27, %c0_28, %c0_29] : memref<1x2x8x128xf32, #tpu.memory_space<vmem>>, vector<1x1x8x128xf32>
      %101 = vector.shape_cast %100 : vector<1x1x8x128xf32> to vector<8x128xf32>
      %102 = arith.addf %101, %97 : vector<8x128xf32>
      %c0_30 = arith.constant 0 : index
      %c0_31 = arith.constant 0 : index
      %c0_32 = arith.constant 0 : index
      %c0_33 = arith.constant 0 : index
      %103 = vector.load %arg5[%c0_30, %c0_31, %c0_32, %c0_33] : memref<1x2x8x128xf32, #tpu.memory_space<vmem>>, vector<1x1x8x128xf32>
      %104 = vector.shape_cast %103 : vector<1x1x8x128xf32> to vector<8x128xf32>
      %105 = vector.shape_cast %102 : vector<8x128xf32> to vector<1x1x8x128xf32>
      tpu.vector_store %arg5[%c0_30, %c0_31, %c0_32, %c0_33], %105 {strides = array<i32>} : memref<1x2x8x128xf32, #tpu.memory_space<vmem>>, vector<1x1x8x128xf32>,
      %c0_34 = arith.constant 0 : index
      %c1_35 = arith.constant 1 : index
      %c0_36 = arith.constant 0 : index
      %c0_37 = arith.constant 0 : index
      %106 = vector.load %arg5[%c0_34, %c1_35, %c0_36, %c0_37] : memref<1x2x8x128xf32, #tpu.memory_space<vmem>>, vector<1x1x8x128xf32>
      %107 = vector.shape_cast %106 : vector<1x1x8x128xf32> to vector<8x128xf32>
      %108 = arith.addf %107, %99 : vector<8x128xf32>
      %c0_38 = arith.constant 0 : index
      %c1_39 = arith.constant 1 : index
      %c0_40 = arith.constant 0 : index
      %c0_41 = arith.constant 0 : index
      %109 = vector.load %arg5[%c0_38, %c1_39, %c0_40, %c0_41] : memref<1x2x8x128xf32, #tpu.memory_space<vmem>>, vector<1x1x8x128xf32>
      %110 = vector.shape_cast %109 : vector<1x1x8x128xf32> to vector<8x128xf32>
      %111 = vector.shape_cast %108 : vector<8x128xf32> to vector<1x1x8x128xf32>
      tpu.vector_store %arg5[%c0_38, %c1_39, %c0_40, %c0_41], %111 {strides = array<i32>} : memref<1x2x8x128xf32, #tpu.memory_space<vmem>>, vector<1x1x8x128xf32>,
    } else {
    }
    return
  }
  func.func @transform_0(%arg0: i32, %arg1: i32) -> (i32, i32, i32) {
    %c0_i32 = arith.constant 0 : i32
    %c0_i32_0 = arith.constant 0 : i32
    return %arg0, %c0_i32, %arg1 : i32, i32, i32
  }
  func.func @transform_1(%arg0: i32, %arg1: i32) -> (i32, i32, i32) {
    %c1_i32 = arith.constant 1 : i32
    %0 = arith.addi %arg1, %c1_i32 : i32
    %c1_i32_0 = arith.constant 1 : i32
    %1 = arith.muli %0, %c1_i32_0 : i32
    %c0_i32 = arith.constant 0 : i32
    %c0_i32_1 = arith.constant 0 : i32
    return %arg0, %c0_i32, %1 : i32, i32, i32
  }
  func.func @transform_2(%arg0: i32, %arg1: i32) -> (i32, i32) {
    %c0_i32 = arith.constant 0 : i32
    %c0_i32_0 = arith.constant 0 : i32
    %c0_i32_1 = arith.constant 0 : i32
    return %c0_i32, %c0_i32_0 : i32, i32
  }
  func.func @transform_3(%arg0: i32, %arg1: i32) -> (i32, i32, i32, i32) {
    %c0_i32 = arith.constant 0 : i32
    %c0_i32_0 = arith.constant 0 : i32
    %c0_i32_1 = arith.constant 0 : i32
    %c0_i32_2 = arith.constant 0 : i32
    return %arg0, %c0_i32, %c0_i32_0, %c0_i32_1 : i32, i32, i32, i32
  }
}

</mosaic_0001>

<bundles_post_ra>
// kernel: tpu_custom_call.1
= control target key start
LH: loop header
LB: loop body
LE: loop exit
PB: predicated region body
PF: predicated region fallthrough
CT: control target
= control target key end

     0   :  { %s1166_s0 = inlined_call_operand.hbm [shape: f32[2,4,256], index: 0, kind: input, shape index: {}]   ;;  %s1167_s1 = inlined_call_operand.hbm [shape: f32[2,4,256], index: 1, kind: input, shape index: {}]   ;;  %s1168_s2 = inlined_call_operand.hbm [shape: f32[8,12], index: 2, kind: input, shape index: {}]   ;;  %s1169_s3 = inlined_call_operand.hbm [shape: f32[2,2,8,128], index: 3, kind: output, shape index: {}]  }
   0x1   :  { %1170 = sst [smem:[#allocation13_spill]] %s1166_s0 }
   0x2   :  { %1171 = sst [smem:[#allocation14_spill]] %s1167_s1 }
   0x3   :  { %8 = vsyncpa [#allocation3], 0 }
   0x4   :  { %10 = vsyncpa [#allocation3 + $0x1], 0 }
   0x5   :  { %11 = vsyncpa [#allocation6], 0 }
   0x6   :  { %13 = vsyncpa [#allocation6 + $0x1], 0 }
   0x7   :  { %14 = vsyncpa [#allocation4], 0 }
   0x8   :  { %16 = vsyncpa [#allocation4 + $0x1], 0  ;;  %s962_s12 = smov 0   ;;  %s964_s13 = smov 0  }
   0x9   :  { %s966_s14 = smov 0   ;;  %s968_s15 = smov 0  }
   0xa   :  { %s970_s16 = smov 0   ;;  %s972_s17 = smov 0  }
   0xb LB: > { %s993_s18 = sadd.s32 4294967295, %s920_s17   ;;  %s614_s19 = sadd.s32 4294967294, %s920_s17   ;;  %s920_s17 = sphi %s972_s17, %s22_s17   ;;  %s916_s16 = sphi %s970_s16, %s1187_s16   ;;  %s912_s15 = sphi %s968_s15, %s1186_s15   ;;  %s908_s14 = sphi %s966_s14, %s1185_s14   ;;  %s904_s13 = sphi %s964_s13, %s1184_s13   ;;  %s900_s12 = sphi %s962_s12, %s1183_s12  }
   0xc   : > { %p56_p0 = scmp.ne.s32.totalorder %s904_s13, %s900_s12  ;;  %p57_p1 = scmp.eq.s32.totalorder %s993_s18, 0 }
   0xd   : > { %p137_p3 = scmp.eq.s32.totalorder %s614_s19, 1  ;;  %p615_p5 = scmp.ge.s32.totalorder %s920_s17, 1 }
   0xe   : > { %p1002_p4 = por %p57_p1, %p56_p0  ;;  %p144_p7 = scmp.lt.s32.totalorder %s920_s17, 3 }
   0xf   : > { %p1007_p6 = por %p137_p3, %p56_p0  ;;  %s922_s23 = smov [#allocation7]  }
  0x10   : > { %p1012_p8 = pnand %p615_p5, %p144_p7  ;;  %s157_s24 = sshll.u32 %s922_s23, 4  ;;  %s158_s24 = int_to_ptr.vmem [resolvable:$true] %s157_s24 }
  0x11   : > { %s1173_s21 = scalar_select %p1007_p6, 1, 0 }
  0x12   : > { %p651_p10 = pneg %p1012_p8  ;;  %s34_s26 = sadd.s32 1, %s916_s16 }
  0x13   : > { %s43_s27 = sadd.s32 1, %s908_s14  ;;  %p36_p12 = scmp.ge.s32.totalorder %s34_s26, 2 }
  0x14   : > { %p1021_p11 = pnand %p651_p10, %p57_p1  ;;  %s760_s28 = scalar_lea.vmem %s158_s24, 128 }
  0x15   : > { %p761_p0 = scmp.ne.s32.totalorder %s158_s24, %s760_s28  ;;  %p768_p7 = scmp.lt.s32.totalorder %s158_s24, %s158_s24 }
  0x16   : > { %p751_p13 = pneg %p1021_p11  ;;  %p769_p2 = scmp.lt.s32.totalorder %s760_s28, %s760_s28 }
  0x18   : > { %p763_p3 = pnand %p761_p0, %p751_p13  ;;  %p770_p9 = por %p769_p2, %p768_p7 }
  0x1a   : > { %p764_p5 = pneg %p763_p3 }
  0x1c   : > { %p771_p6 = pnand %p770_p9, %p764_p5 }
  0x1e   : > { %774 = shalt.err (!%p771_p6)
}
  0x1f   : > { %654 = dma.hbm_to_vmem [thread:$0]  (!%p1021_p11), %s1168_s2, 128, %s158_s24, [#allocation6]  }
  0x20   : > { %s1189_s26 = smov (%p36_p12, %s34_s26), 0  ;;  %p50_p2 = scmp.ne.s32.totalorder %s908_s14, %s904_s13 }
  0x21   : > { %p51_p6 = scmp.eq.s32.totalorder %s920_s17, 0  ;;  %s38_s4 = ssub.s32 %s916_s16, %s1189_s26 }
  0x22   : > { %p667_p9 = scmp.lt.s32.totalorder %s920_s17, 2  ;;  %p41_p10 = scmp.eq.s32.totalorder %s38_s4, 0 }
  0x23   : > { %p52_p13 = por %p51_p6, %p50_p2  ;;  %p1176_p0 = scmp.eq.s32.totalorder %s993_s18, 1 }
  0x24   : > { %s168_s6 = sand.u32 1, %s908_s14   ;;  %s638_s9 = sshll.u32 %s916_s16, 7 }
  0x25   : > { %p1044_p3 = por %p1176_p0, %p50_p2  ;;  %s618_s8 = sshll.u32 %s168_s6, 2 }
  0x26   : > { %s1050_s7 = scalar_select %p41_p10, %s908_s14, %s43_s27  }
  0x27   : > { %s1178_s0 = sld [smem:[#allocation13_spill]]  ;;  %s172_s23 = scalar_lea.vmem [#allocation2], %s618_s8 }
  0x28   : > { %s181_s24 = sshll.u32 %s172_s23, 4  ;;  %p1056_p11 = pnand %p667_p9, %p52_p13  ;;  %s182_s24 = int_to_ptr.vmem [resolvable:$true] %s181_s24 }
  0x29   : > { %s1180_s1 = sld [smem:[#allocation14_spill]]  ;;  %s188_s30 = sand.u32 1, %s920_s17  }
  0x2a   : > { %s169_s4 = scalar_lea.sflag [#allocation3], %s168_s6  ;;  %p777_p12 = pneg %p1056_p11 }
  0x2b   : > { %s788_s10 = scalar_lea.vmem %s182_s24, 64  ;;  %s923_s11 = smov [#allocation2]  }
  0x2c   : > { %p789_p5 = scmp.ne.s32.totalorder %s182_s24, %s788_s10  ;;  %s793_s23 = sshll.u32 %s923_s11, 4  ;;  %s794_s23 = int_to_ptr.vmem [resolvable:$false] %s793_s23 }
  0x2d   : > { %s179_s19 = scalar_lea.hbm %s1178_s0, %s638_s9  ;;  %s795_s0 = scalar_lea.vmem %s794_s23, 128 }
  0x2e   : > { %p791_p7 = pnand %p789_p5, %p777_p12  ;;  %p796_p6 = scmp.lt.s32.totalorder %s182_s24, %s794_s23 }
  0x2f   : > { %s1063_s27 = scalar_lea.hbm %s1180_s1, %s638_s9  ;;  %p797_p9 = scmp.lt.s32.totalorder %s795_s0, %s788_s10 }
  0x30   : > { %p792_p2 = pneg %p791_p7 }
  0x31   : > { %p798_p10 = por %p797_p9, %p796_p6 }
  0x33   : > { %p799_p13 = pnand %p798_p10, %p792_p2 }
  0x35   : > { %802 = shalt.err (!%p799_p13)
}
  0x36   : > { %658 = dma.hbm_to_vmem [thread:$0]  (!%p1056_p11), %s179_s19, 64, %s182_s24, %s169_s4  }
  0x37   : > { %s539_s6 = scalar_lea.hbm %s1063_s27, 64  ;;  %s192_s9 = scalar_lea.vmem [#allocation5], %s618_s8 }
  0x38   : > { %s202_s28 = sshll.u32 %s192_s9, 4  ;;  %s189_s29 = scalar_lea.sflag [#allocation6], %s188_s30  ;;  %s203_s28 = int_to_ptr.vmem [resolvable:$true] %s202_s28 }
  0x39   : > { %s816_s1 = scalar_lea.vmem %s203_s28, 64  ;;  %s924_s0 = smov [#allocation5]  }
  0x3a   : > { %p817_p0 = scmp.ne.s32.totalorder %s203_s28, %s816_s1  ;;  %s821_s10 = sshll.u32 %s924_s0, 4  ;;  %s822_s10 = int_to_ptr.vmem [resolvable:$false] %s821_s10 }
  0x3b   : > { %s823_s11 = scalar_lea.vmem %s822_s10, 128  ;;  %p824_p2 = scmp.lt.s32.totalorder %s203_s28, %s822_s10 }
  0x3c   : > { %p819_p5 = pnand %p817_p0, %p777_p12  ;;  %p825_p6 = scmp.lt.s32.totalorder %s823_s11, %s816_s1 }
  0x3e   : > { %p820_p7 = pneg %p819_p5  ;;  %p826_p9 = por %p825_p6, %p824_p2 }
  0x40   : > { %p827_p10 = pnand %p826_p9, %p820_p7 }
  0x42   : > { %830 = shalt.err (!%p827_p10)
}
  0x43   : > { %661 = dma.hbm_to_vmem [thread:$0]  (!%p1056_p11), %s539_s6, 64, %s203_s28, %s189_s29  }
  0x44   : > { %211 = sbr.rel (%p1012_p8) target bundleno = 374 (0x176), region = 32  ;;  %s1082_s8 = sand.u32 (!%p1012_p8), 1, %s904_s13  }
  0x45   : > { %s625_s19 = sshll.u32 (!%p1012_p8), %s1082_s8, 2  ;;  %s214_s24 = scalar_lea.sflag (!%p1012_p8), [#allocation3], %s1082_s8 }
  0x46   : > { %s1086_s27 = scalar_lea.vmem (!%p1012_p8), [#allocation2], %s625_s19 }
  0x49   : > { %883 = dma.done.wait (%p1002_p4), %s214_s24, 64  }
  0x4a   : > { %885 = vsyncadd (%p1002_p4), %s214_s24, 4294967232  ;;  %s222_s1 = sand.u32 1, %s993_s18   ;;  %s1093_s25 = scalar_lea.vmem [#allocation5], %s625_s19 }
  0x4b   : > { %s223_s22 = scalar_lea.sflag [#allocation6], %s222_s1 }
  0x4c   : > { %887 = dma.done.wait (%p1002_p4), %s223_s22, 64  }
  0x4d   : > { %889 = vsyncadd (%p1002_p4), %s223_s22, 4294967232 }
  0x4e   : > { %891 = dma.done.wait (%p57_p1), [#allocation6], 128  }
  0x4f   : > { %893 = vsyncadd (%p57_p1), [#allocation6], 4294967168  ;;  %v925_v0 = vmov 4   ;;  %v926_v1 = vmov 6   ;;  %v267_v2 = vld [vmem:[#allocation7] sm:$0xff]  ;;  %v927_v3 = vmov 5   ;;  %v273_v13 = vlaneseq }
  0x50   : > { %736 = vset.pattern.permute.xlu0 %v925_v0  ;;  %738 = vset.pattern.permute.xlu1 %v926_v1  ;;  %v928_v4 = vmov 7   ;;  %v929_v5 = vmov 8   ;;  %v930_v6 = vmov 9   ;;  %v931_v7 = vmov 10   ;;  %v265_v16 = vld [vmem:[%s1086_s27] sm:$0xf] }
  0x51   : > { %310 = vperm.xlu0 %736, %v267_v2   ;;  %349 = vperm.xlu1 %738, %v267_v2   ;;  %v932_v8 = vmov 0   ;;  %v933_v9 = vmov 11   ;;  %v934_v10 = vmov 3   ;;  %v935_v11 = vmov 1   ;;  %v266_v18 = vld [vmem:[%s1093_s25] sm:$0xf] }
  0x52   : > { %v936_v12 = vmov 2   ;;  %v274_v14 = vshrl.u32 %v273_v13, 7  ;;  %s937_s18 = smov 126   ;;  %s938_s20 = smov 124   ;;  %vm325_vm0 = vcmask 1031168   ;;  %vm398_vm1 = vcmask 1014784  }
  0x53   : > { %s628_s30 = sshll.u32 %s1082_s8, 4  ;;  %s640_s4 = sshll.u32 %s912_s15, 8 }
  0x54   : > { %v275_v15 = vsub.s32 0, %v274_v14  ;;  %v285_v19 = vsub.s32 1, %v274_v14  ;;  %v295_v21 = vsub.s32 2, %v274_v14  ;;  %v305_v28 = vsub.s32 3, %v274_v14  ;;  %s257_s23 = scalar_lea.vmem [#allocation8], %s628_s30  ;;  %s1116_s29 = scalar_lea.hbm %s1169_s3, %s640_s4 }
  0x55   : > { %737 = vset.pattern.permute.xlu0 %v927_v3  ;;  %739 = vset.pattern.permute.xlu1 %v928_v4  ;;  %s495_s6 = sshll.u32 %s257_s23, 4  ;;  %s482_s0 = scalar_lea.sflag [#allocation4], %s1082_s8  ;;  %s1118_s6 = int_to_ptr.vmem [resolvable:$true] %s495_s6 }
  0x56   : > { %330 = vperm.xlu0 %737, %v267_v2   ;;  %368 = vperm.xlu1 %739, %v267_v2   ;;  %v276_v17 = vrot.slane %v265_v16, %v275_v15  ;;  %v316_v23 = vrot.slane %v266_v18, %v275_v15  ;;  %v286_v25 = vrot.slane %v265_v16, %v285_v19  ;;  %s832_s10 = scalar_lea.vmem %s1118_s6, 256  ;;  %s939_s15 = smov [#allocation8]  }
  0x57   : > { %v336_v26 = vrot.slane %v266_v18, %v285_v19  ;;  %v296_v27 = vrot.slane %v265_v16, %v295_v21  ;;  %v306_v35 = vrot.slane %v265_v16, %v305_v28  ;;  %v355_v36 = vrot.slane %v266_v18, %v295_v21  ;;  %p833_p1 = scmp.ne.s32.totalorder %s1118_s6, %s832_s10  ;;  %s836_s11 = sshll.u32 %s939_s15, 4  ;;  %s837_s11 = int_to_ptr.vmem [resolvable:$false] %s836_s11 }
  0x58   : > { %v374_v37 = vrot.slane %v266_v18, %v305_v28  ;;  %s838_s19 = scalar_lea.vmem %s837_s11, 512  ;;  %p839_p11 = scmp.lt.s32.totalorder %s1118_s6, %s837_s11 }
  0x59   : > { %p834_p4 = pnand %p833_p1, %p1044_p3  ;;  %p840_p12 = scmp.lt.s32.totalorder %s838_s19, %s832_s10 }
  0x5a   : > { %740 = vset.pattern.permute.xlu1 %v929_v5  ;;  %741 = vset.pattern.permute.xlu0 %v930_v6 }
  0x5b   : > { %387 = vperm.xlu1 %740, %v267_v2   ;;  %403 = vperm.xlu0 %741, %v267_v2   ;;  %p835_p8 = pneg %p834_p4  ;;  %p841_p13 = por %p840_p12, %p839_p11 }
  0x5d   : > { %p842_p0 = pnand %p841_p13, %p835_p8 }
  0x5f   : > { %742 = vset.pattern.permute.xlu1 %v931_v7  ;;  %744 = vset.pattern.permute.xlu0 %v932_v8 }
  0x60   : > { %418 = vperm.xlu1 %742, %v267_v2   ;;  %270 = vperm.xlu0 %744, %v267_v2  }
  0x64   : > { %743 = vset.pattern.permute.xlu1 %v933_v9  ;;  %747 = vset.pattern.permute.xlu0 %v934_v10 }
  0x65   : > { %433 = vperm.xlu1 %743, %v267_v2   ;;  %300 = vperm.xlu0 %747, %v267_v2  }
  0x69   : > { %745 = vset.pattern.permute.xlu1 %v935_v11  ;;  %748 = vset.pattern.permute.xlu0 %v933_v9 }
  0x6a   : > { %280 = vperm.xlu1 %745, %v267_v2  }
  0x6e   : > { %746 = vset.pattern.permute.xlu1 %v936_v12 }
  0x6f   : > { %290 = vperm.xlu1 %746, %v267_v2  }
  0xcc   : > { %v311_v20 = vpop.permute.xlu0 %310  ;;  %v350_v22 = vpop.permute.xlu1 %349 }
  0xcd   : > { %v317_v24 = vmul.f32 %v311_v20, %v276_v17  ;;  %v318_v29 = vmul.f32 %v316_v23, %v311_v20  ;;  %v356_v34 = vmul.f32 %v350_v22, %v296_v27  ;;  %v357_v40 = vmul.f32 %v355_v36, %v350_v22 }
  0xcf   : > { %321 = vrot.lane.b32.xlu1 %v317_v24, %s937_s18 }
  0xd1   : > { %v331_v30 = vpop.permute.xlu0 %330  ;;  %v369_v31 = vpop.permute.xlu1 %368 }
  0xd2   : > { %v337_v32 = vmul.f32 %v331_v30, %v286_v25  ;;  %v338_v33 = vmul.f32 %v336_v26, %v331_v30  ;;  %v375_v39 = vmul.f32 %v369_v31, %v306_v35  ;;  %v376_v41 = vmul.f32 %v374_v37, %v369_v31 }
  0xd3   : > { %323 = vrot.lane.b32.xlu1 %v318_v29, %s937_s18 }
  0xd4   : > { %341 = vrot.lane.b32.xlu0 %v337_v32, %s937_s18 }
  0xd6   : > { %v388_v38 = vpop.permute.xlu1 %387  ;;  %v404_v44 = vpop.permute.xlu0 %403 }
  0xd7   : > { %343 = vrot.lane.b32.xlu1 %v338_v33, %s937_s18  ;;  %v390_v43 = vmul.f32 %v388_v38, %v276_v17  ;;  %v391_v45 = vmul.f32 %v388_v38, %v316_v23  ;;  %v406_v46 = vmul.f32 %v404_v44, %v286_v25  ;;  %v407_v49 = vmul.f32 %v404_v44, %v336_v26 }
  0xd8   : > { %360 = vrot.lane.b32.xlu0 %v356_v34, %s937_s18 }
  0xdb   : > { %362 = vrot.lane.b32.xlu1 %v357_v40, %s937_s18  ;;  %v419_v42 = vpop.permute.xlu1 %418  ;;  %v271_v48 = vpop.permute.xlu0 %270 }
  0xdc   : > { %379 = vrot.lane.b32.xlu0 %v375_v39, %s937_s18  ;;  %v421_v50 = vmul.f32 %v419_v42, %v296_v27  ;;  %v277_v51 = vmul.f32 %v276_v17, %v271_v48  ;;  %v422_v54 = vmul.f32 %v419_v42, %v355_v36 }
  0xdf   : > { %381 = vrot.lane.b32.xlu1 %v376_v41, %s937_s18 }
  0xe0   : > { %394 = vrot.lane.b32.xlu0 %v390_v43, %s938_s20  ;;  %v434_v47 = vpop.permute.xlu1 %433  ;;  %v301_v57 = vpop.permute.xlu0 %300 }
  0xe1   : > { %v436_v55 = vmul.f32 %v434_v47, %v306_v35  ;;  %v437_v59 = vmul.f32 %v434_v47, %v374_v37  ;;  %v307_v61 = vmul.f32 %v306_v35, %v301_v57 }
  0xe3   : > { %396 = vrot.lane.b32.xlu1 %v391_v45, %s938_s20 }
  0xe4   : > { %410 = vrot.lane.b32.xlu0 %v406_v46, %s938_s20 }
  0xe5   : > { %v281_v52 = vpop.permute.xlu1 %280 }
  0xe6   : > { %v287_v53 = vmul.f32 %v286_v25, %v281_v52 }
  0xe7   : > { %412 = vrot.lane.b32.xlu1 %v407_v49, %s938_s20 }
  0xe8   : > { %425 = vrot.lane.b32.xlu0 %v421_v50, %s938_s20  ;;  %v288_v56 = vadd.f32 %v287_v53, %v277_v51 }
  0xea   : > { %v291_v58 = vpop.permute.xlu1 %290 }
  0xeb   : > { %427 = vrot.lane.b32.xlu1 %v422_v54, %s938_s20  ;;  %v297_v60 = vmul.f32 %v296_v27, %v291_v58  ;;  %v465_v27 = vand.u32 127, %v273_v13 }
  0xec   : > { %440 = vrot.lane.b32.xlu0 %v436_v55, %s938_s20 }
  0xed   : > { %v298_v62 = vadd.f32 %v297_v60, %v288_v56  ;;  %vm469_vm2 = vcmp.lt.s32.totalorder %v465_v27, 16 }
  0xef   : > { %442 = vrot.lane.b32.xlu1 %v437_v59, %s938_s20  ;;  %v308_v63 = vadd.f32 %v307_v61, %v298_v62 }
 0x141   : > { %v322_v0 = vpop.permute.xlu1 %321 }
 0x145   : > { %v324_v1 = vpop.permute.xlu1 %323 }
 0x146   : > { %v342_v2 = vpop.permute.xlu0 %341  ;;  %v326_v8 = vsel %vm325_vm0, %v322_v0, %v324_v1 }
 0x147   : > { %v328_v11 = vadd.f32 %v326_v8, %v308_v63 }
 0x149   : > { %v344_v3 = vpop.permute.xlu1 %343 }
 0x14a   : > { %v361_v4 = vpop.permute.xlu0 %360  ;;  %v345_v10 = vsel %vm325_vm0, %v342_v2, %v344_v3 }
 0x14b   : > { %v347_v16 = vadd.f32 %v345_v10, %v328_v11 }
 0x14d   : > { %v363_v5 = vpop.permute.xlu1 %362 }
 0x14e   : > { %v380_v6 = vpop.permute.xlu0 %379  ;;  %v364_v14 = vsel %vm325_vm0, %v361_v4, %v363_v5 }
 0x14f   : > { %v366_v18 = vadd.f32 %v364_v14, %v347_v16 }
 0x151   : > { %v382_v7 = vpop.permute.xlu1 %381 }
 0x152   : > { %v395_v9 = vpop.permute.xlu0 %394  ;;  %v383_v17 = vsel %vm325_vm0, %v380_v6, %v382_v7 }
 0x153   : > { %v385_v22 = vadd.f32 %v383_v17, %v366_v18 }
 0x155   : > { %v397_v12 = vpop.permute.xlu1 %396 }
 0x156   : > { %v411_v15 = vpop.permute.xlu0 %410  ;;  %v399_v20 = vsel %vm398_vm1, %v395_v9, %v397_v12 }
 0x157   : > { %v401_v24 = vadd.f32 %v399_v20, %v385_v22 }
 0x159   : > { %v413_v19 = vpop.permute.xlu1 %412 }
 0x15a   : > { %v426_v21 = vpop.permute.xlu0 %425  ;;  %v414_v23 = vsel %vm398_vm1, %v411_v15, %v413_v19 }
 0x15b   : > { %v416_v28 = vadd.f32 %v414_v23, %v401_v24 }
 0x15d   : > { %v428_v25 = vpop.permute.xlu1 %427 }
 0x15e   : > { %v429_v26 = vsel %vm398_vm1, %v426_v21, %v428_v25  ;;  %v441_v29 = vpop.permute.xlu0 %440 }
 0x15f   : > { %v431_v30 = vadd.f32 %v429_v26, %v416_v28 }
 0x161   : > { %v443_v31 = vpop.permute.xlu1 %442 }
 0x162   : > { %v444_v32 = vsel %vm398_vm1, %v441_v29, %v443_v31 }
 0x163   : > { %v446_v33 = vadd.f32 %v444_v32, %v431_v30 }
 0x165   : > { %v470_v34 = vsel %vm469_vm2, %v446_v33, 0.0 }
 0x166   : > { %v472_v35 = vmul.f32 %v470_v34, %v470_v34  ;;  %476 = vst [vmem:[%s257_s23] sm:$0xff] %v470_v34 }
 0x168   : > { %632 = vst [vmem:[%s257_s23 + $0x8] sm:$0xff] %v472_v35 }
 0x169   : > { %845 = shalt.err (!%p842_p0)
}
 0x16a   : > { %s846_s24 = scalar_lea.hbm %s1116_s29, 256  ;;  %s850_s22 = scalar_lea.hbm %s1169_s3, 512 }
 0x16b   : > { %p847_p5 = scmp.ne.s32.totalorder %s1116_s29, %s846_s24  ;;  %p851_p6 = scmp.lt.s32.totalorder %s1116_s29, %s1169_s3 }
 0x16c   : > { %p852_p9 = scmp.lt.s32.totalorder %s850_s22, %s846_s24 }
 0x16d   : > { %p848_p7 = pnand %p847_p5, %p1044_p3 }
 0x16e   : > { %p853_p10 = por %p852_p9, %p851_p6 }
 0x16f   : > { %p849_p2 = pneg %p848_p7 }
 0x171   : > { %p854_p1 = pnand %p853_p10, %p849_p2 }
 0x173   : > { %857 = shalt.err (!%p854_p1)
}
 0x174   : > { %s940_s20 = smov 128   ;;  %s941_s30 = smov 8  }
 0x175   : > { %649 = dma.vmem_to_hbm [thread:$0]  (%p1044_p3), %s1118_s6, 256, %s1116_s29, %s482_s0, %s940_s20, %s940_s20, %s941_s30  }
 0x176 PF: > { %s510_s4 = sand.u32 1, %s900_s12   ;;  %p1181_p4 = scmp.ne.s32.totalorder %s1173_s21, 0 }
 0x177   : > { %p1182_p8 = scmp.ge.s32.totalorder %s920_s17, 2  ;;  %s511_s23 = scalar_lea.sflag [#allocation4], %s510_s4 }
 0x179   : > { %p663_p11 = pnand %p1182_p8, %p1181_p4 }
 0x17b   : > { %p664_p12 = pneg %p663_p11 }
 0x17d   : > { %895 = dma.done.wait (%p664_p12), %s511_s23, 256  }
 0x17e   : > { %897 = vsyncadd (%p664_p12), %s511_s23, 4294967040  ;;  %s22_s17 = sadd.s32 1, %s920_s17   ;;  %s1183_s12 = smov %s904_s13 }
 0x17f   : > { %p19_p13 = scmp.ge.s32.totalorder %s22_s17, 4   ;;  %s1184_s13 = smov %s908_s14 }
 0x180   : > { %s1185_s14 = smov %s1050_s7  ;;  %s1186_s15 = smov %s916_s16 }
 0x181   : > { %s1187_s16 = smov %s1189_s26  ;;  %21 = sbr.rel (!%p19_p13) target bundleno = 11 (0xb), region = 108 }
 0x186   :  { %516 = vsyncpa [#allocation3], 1 }
 0x187   :  { %518 = vsyncpa [#allocation3 + $0x1], 1 }
 0x188   :  { %519 = vsyncpa [#allocation6], 1 }
 0x189   :  { %521 = vsyncpa [#allocation6 + $0x1], 1 }
 0x18a   :  { %522 = vsyncpa [#allocation4], 1 }
 0x18b   :  { %524 = vsyncpa [#allocation4 + $0x1], 1 }

</bundles_post_ra>
